<compile_context>
chip_gen: v6e
topology: v6e:2x2x1
jax: 0.10.0
libtpu: 0.0.40
codegen_flags: <defaults>
</compile_context>

<pallas_src>
import math

import jax
import jax.numpy as jnp
from jax.experimental import pallas as pl
from jax.experimental.pallas import tpu as pltpu

# ---- Module constants (mirroring the PyTorch script) -----------------------
network_area = (800, 800)
input_dim = len(network_area)  # 2

action_space = [(0, 1), (0, 2), (0, 3), (0, 4), (1, 1), (2, 2), (3, 3), (4, 4),
                (1, 0), (2, 0), (3, 0), (4, 0), (1, -1), (2, -2), (3, -3),
                (4, -4), (0, -1), (0, -2), (0, -3), (0, -4), (-1, -1), (-2, -2),
                (-3, -3), (-4, -4), (-1, 0), (-2, 0), (-3, 0), (-4, 0),
                (-1, 1), (-2, 2), (-3, 3), (-4, 4), (0, 0)]
num_actions = len(action_space)  # 33
output_dim = num_actions

HIDDEN1 = 128
HIDDEN2 = 128
HIDDEN3 = 64
LANE = 128          # lane-padded width for fc3 / fc4 / output
H3_PAD = LANE       # 64  -> 128
OUT_PAD = LANE      # 33  -> 128

# Fused weight slab row ranges (axis 0 of a (384, 128) f32 array):
W2_LO, W2_HI = 0, HIDDEN1                     # [0, 128)   w2: (128, 128)
W3_LO, W3_HI = W2_HI, W2_HI + HIDDEN2         # [128, 256) w3 padded: (128, 128)
W4_LO, W4_HI = W3_HI, W3_HI + H3_PAD          # [256, 384) w4 padded: (128, 128)
WSLAB_ROWS = W4_HI                            # 384

# Rows of the packed (8, 128) bias / w1 slab:
#   0: b1   1: b2   2: b3 (padded)   3: b4 (padded)   4: w1 row 0   5: w1 row 1
ROW_B1, ROW_B2, ROW_B3, ROW_B4, ROW_W1A, ROW_W1B = 0, 1, 2, 3, 4, 5


def _round_up(n, m):
    return ((n + m - 1) // m) * m


# ---- Pallas kernel: fused 4-layer MLP forward over one batch tile -----------
def dqn_kernel(x_ref, w_ref, pack_ref, out_ref):
    x = x_ref[...]            # (TB, 2) f32
    pack = pack_ref[...]      # (8, 128) f32

    # fc1 + relu — K=2, so do it on the VPU as two broadcast multiply-adds
    # instead of paying MXU push/pop cadence for 2 accumulation steps.
    h1 = (x[:, 0:1] * pack[ROW_W1A:ROW_W1A + 1, :]
          + x[:, 1:2] * pack[ROW_W1B:ROW_W1B + 1, :]
          + pack[ROW_B1:ROW_B1 + 1, :])
    h1 = jnp.maximum(h1, 0.0)                                   # (TB, 128)

    # fc2 + relu (MXU) — static ref slices into the resident weight slab.
    h2 = jnp.dot(h1, w_ref[W2_LO:W2_HI, :],
                 preferred_element_type=jnp.float32)
    h2 = jnp.maximum(h2 + pack[ROW_B2:ROW_B2 + 1, :], 0.0)      # (TB, 128)

    # fc3 + relu (MXU) — output lane-padded 64 -> 128, padded lanes stay 0.
    h3 = jnp.dot(h2, w_ref[W3_LO:W3_HI, :],
                 preferred_element_type=jnp.float32)
    h3 = jnp.maximum(h3 + pack[ROW_B3:ROW_B3 + 1, :], 0.0)      # (TB, 128)

    # fc4 (MXU, no activation) — output lane-padded 33 -> 128.
    out = jnp.dot(h3, w_ref[W4_LO:W4_HI, :],
                  preferred_element_type=jnp.float32)
    out = out + pack[ROW_B4:ROW_B4 + 1, :]                      # (TB, 128)

    out_ref[...] = out.astype(out_ref.dtype)                    # unmasked vst


# ---- One-time packing of raw params into the kernel layout ------------------
def pack_params(p):
    """Pad fc3/fc4 to 128 lanes; pack w2/w3/w4 into one (384,128) slab and
    biases + w1 rows into one (8,128) slab."""
    wslab = jnp.zeros((WSLAB_ROWS, LANE), jnp.float32)
    wslab = wslab.at[W2_LO:W2_HI, :HIDDEN2].set(p["w2"])
    wslab = wslab.at[W3_LO:W3_HI, :HIDDEN3].set(p["w3"])
    wslab = wslab.at[W4_LO:W4_LO + HIDDEN3, :output_dim].set(p["w4"])

    pack = jnp.zeros((8, LANE), jnp.float32)
    pack = pack.at[ROW_B1, :HIDDEN1].set(p["b1"].reshape(-1))
    pack = pack.at[ROW_B2, :HIDDEN2].set(p["b2"].reshape(-1))
    pack = pack.at[ROW_B3, :HIDDEN3].set(p["b3"].reshape(-1))
    pack = pack.at[ROW_B4, :output_dim].set(p["b4"].reshape(-1))
    pack = pack.at[ROW_W1A, :HIDDEN1].set(p["w1"][0, :])
    pack = pack.at[ROW_W1B, :HIDDEN1].set(p["w1"][1, :])

    return {"wslab": wslab, "pack": pack}


# ---- Wrapper: batch-tiled pallas_call ---------------------------------------
def dqn_forward(x, packed, *, tile_b=512):
    """x: (B, input_dim) f32. packed: output of pack_params."""
    B = x.shape[0]

    # Pick the batch tile: multiple of 8, no larger than the (8-rounded) batch.
    TB = max(8, min(_round_up(tile_b, 8), _round_up(B, 8)))
    Bp = _round_up(B, TB)
    if Bp != B:
        x = jnp.pad(x, ((0, Bp - B), (0, 0)))

    nb = Bp // TB

    # Advisory cost hint for XLA's scheduler around the custom call.
    flops = 2 * Bp * (input_dim * HIDDEN1 + HIDDEN1 * HIDDEN2
                      + HIDDEN2 * H3_PAD + H3_PAD * OUT_PAD)
    bytes_accessed = 4 * (Bp * input_dim + WSLAB_ROWS * LANE
                          + 8 * LANE + Bp * OUT_PAD)
    cost = pl.CostEstimate(flops=int(flops), transcendentals=0,
                           bytes_accessed=int(bytes_accessed))

    out_padded = pl.pallas_call(
        dqn_kernel,
        out_shape=jax.ShapeDtypeStruct((Bp, OUT_PAD), jnp.float32),
        grid=(nb,),
        in_specs=[
            pl.BlockSpec((TB, input_dim), lambda i: (i, 0)),       # x tile
            pl.BlockSpec((WSLAB_ROWS, LANE), lambda i: (0, 0)),    # fused weights (resident)
            pl.BlockSpec((8, LANE), lambda i: (0, 0)),             # bias/w1 pack
        ],
        out_specs=pl.BlockSpec((TB, OUT_PAD), lambda i: (i, 0)),
        compiler_params=pltpu.CompilerParams(
            dimension_semantics=("parallel",),   # v7x: shard tiles over 2 TCs
        ),
        cost_estimate=cost,
    )(x, packed["wslab"], packed["pack"])

    # Strip batch padding and the 33->128 lane padding in plain JAX.
    return out_padded[:B, :output_dim]


# ---- Deterministic parameter init (PyTorch nn.Linear-style uniform) ---------
def init_params(key):
    def linear(key, fan_in, fan_out):
        kw, kb = jax.random.split(key)
        bound = 1.0 / math.sqrt(fan_in)
        w = jax.random.uniform(kw, (fan_in, fan_out), jnp.float32, -bound, bound)
        b = jax.random.uniform(kb, (fan_out,), jnp.float32, -bound, bound)
        return w, b

    k1, k2, k3, k4 = jax.random.split(key, 4)
    w1, b1 = linear(k1, input_dim, HIDDEN1)
    w2, b2 = linear(k2, HIDDEN1, HIDDEN2)
    w3, b3 = linear(k3, HIDDEN2, HIDDEN3)
    w4, b4 = linear(k4, HIDDEN3, output_dim)
    return {"w1": w1, "b1": b1, "w2": w2, "b2": b2,
            "w3": w3, "b3": b3, "w4": w4, "b4": b4}


# ---- Pure-JAX reference for a sanity check ----------------------------------
def dqn_ref(x, p):
    h = jnp.maximum(x @ p["w1"] + p["b1"], 0.0)
    h = jnp.maximum(h @ p["w2"] + p["b2"], 0.0)
    h = jnp.maximum(h @ p["w3"] + p["b3"], 0.0)
    return h @ p["w4"] + p["b4"]


if __name__ == "__main__":
    key = jax.random.PRNGKey(0)
    kp, kx = jax.random.split(key)

    params = init_params(kp)
    packed = pack_params(params)   # one-time padding/packing, reused per call

    # Small replay-buffer-style batch of 2-D UAV (x, y) states.
    B = 64
    x = jax.random.uniform(kx, (B, input_dim), jnp.float32,
                           0.0, float(network_area[0]))

    out = dqn_forward(x, packed, tile_b=512)
    out = jax.block_until_ready(out)

    ref = dqn_ref(x, params)
    assert out.shape == (B, output_dim), out.shape
    assert jnp.allclose(out, ref, atol=1e-3, rtol=1e-3), "mismatch vs reference"

    # Also exercise a batch that is not a multiple of the tile / of 8,
    # and one that spans multiple grid steps.
    x_small = x[:5]
    out_small = jax.block_until_ready(dqn_forward(x_small, packed, tile_b=512))
    assert out_small.shape == (5, output_dim)
    assert jnp.allclose(out_small, ref[:5], atol=1e-3, rtol=1e-3)

    out_multi = jax.block_until_ready(dqn_forward(x, packed, tile_b=16))
    assert jnp.allclose(out_multi, ref, atol=1e-3, rtol=1e-3)

    print("KERNEL_OK")
</pallas_src>

<mosaic_0001>
module attributes {stable_mosaic.version = 11 : i64} {
  func.func @dqn_kernel(%arg0: i32, %arg1: memref<64x2xf32, #tpu.memory_space<vmem>>, %arg2: memref<384x128xf32, #tpu.memory_space<vmem>>, %arg3: memref<8x128xf32, #tpu.memory_space<vmem>>, %arg4: memref<64x128xf32, #tpu.memory_space<vmem>>) attributes {dimension_semantics = [#tpu.dimension_semantics<parallel>], iteration_bounds = array<i64: 1>, scalar_prefetch = 0 : i64, scratch_operands = 0 : i64, tpu.core_type = #tpu.core_type<tc>, window_params = [{transform_indices = @transform_0, window_bounds = array<i64: 64, 2>}, {pipeline_mode = #tpu.pipeline_mode<synchronous>, transform_indices = @transform_1, window_bounds = array<i64: 384, 128>}, {pipeline_mode = #tpu.pipeline_mode<synchronous>, transform_indices = @transform_2, window_bounds = array<i64: 8, 128>}, {transform_indices = @transform_3, window_bounds = array<i64: 64, 128>}]} {
    %c0 = arith.constant 0 : index
    %c0_0 = arith.constant 0 : index
    %0 = vector.load %arg1[%c0, %c0_0] : memref<64x2xf32, #tpu.memory_space<vmem>>, vector<64x2xf32>
    %c0_1 = arith.constant 0 : index
    %c0_2 = arith.constant 0 : index
    %1 = vector.load %arg3[%c0_1, %c0_2] : memref<8x128xf32, #tpu.memory_space<vmem>>, vector<8x128xf32>
    %2 = vector.extract_strided_slice %0 {offsets = [0, 0], sizes = [64, 1], strides = [1, 1]} : vector<64x2xf32> to vector<64x1xf32>
    %3 = vector.extract_strided_slice %1 {offsets = [4, 0], sizes = [1, 128], strides = [1, 1]} : vector<8x128xf32> to vector<1x128xf32>
    %4 = vector.broadcast %2 : vector<64x1xf32> to vector<64x128xf32>
    %5 = vector.broadcast %3 : vector<1x128xf32> to vector<64x128xf32>
    %6 = arith.mulf %4, %5 : vector<64x128xf32>
    %7 = vector.extract_strided_slice %0 {offsets = [0, 1], sizes = [64, 1], strides = [1, 1]} : vector<64x2xf32> to vector<64x1xf32>
    %8 = vector.extract_strided_slice %1 {offsets = [5, 0], sizes = [1, 128], strides = [1, 1]} : vector<8x128xf32> to vector<1x128xf32>
    %9 = vector.broadcast %7 : vector<64x1xf32> to vector<64x128xf32>
    %10 = vector.broadcast %8 : vector<1x128xf32> to vector<64x128xf32>
    %11 = arith.mulf %9, %10 : vector<64x128xf32>
    %12 = arith.addf %6, %11 : vector<64x128xf32>
    %13 = vector.extract_strided_slice %1 {offsets = [0, 0], sizes = [1, 128], strides = [1, 1]} : vector<8x128xf32> to vector<1x128xf32>
    %14 = vector.broadcast %13 : vector<1x128xf32> to vector<64x128xf32>
    %15 = arith.addf %12, %14 : vector<64x128xf32>
    %cst = arith.constant 0.000000e+00 : f32
    %16 = vector.broadcast %cst : f32 to vector<64x128xf32>
    %17 = arith.maximumf %15, %16 : vector<64x128xf32>
    %c0_3 = arith.constant 0 : index
    %c0_4 = arith.constant 0 : index
    %18 = vector.load %arg2[%c0_3, %c0_4] : memref<384x128xf32, #tpu.memory_space<vmem>>, vector<128x128xf32>
    %cst_5 = arith.constant dense<0.000000e+00> : vector<64x128xf32>
    %19 = tpu.matmul %17, %18, %cst_5 {dimension_numbers = #tpu.dot_dimension_numbers<[1], [0], [0], [1], [0, 0, 1, 1], [], []>} : vector<64x128xf32>, vector<128x128xf32>, vector<64x128xf32> -> vector<64x128xf32>
    %20 = vector.extract_strided_slice %1 {offsets = [1, 0], sizes = [1, 128], strides = [1, 1]} : vector<8x128xf32> to vector<1x128xf32>
    %21 = vector.broadcast %20 : vector<1x128xf32> to vector<64x128xf32>
    %22 = arith.addf %19, %21 : vector<64x128xf32>
    %cst_6 = arith.constant 0.000000e+00 : f32
    %23 = vector.broadcast %cst_6 : f32 to vector<64x128xf32>
    %24 = arith.maximumf %22, %23 : vector<64x128xf32>
    %c128 = arith.constant 128 : index
    %c0_7 = arith.constant 0 : index
    %25 = vector.load %arg2[%c128, %c0_7] : memref<384x128xf32, #tpu.memory_space<vmem>>, vector<128x128xf32>
    %cst_8 = arith.constant dense<0.000000e+00> : vector<64x128xf32>
    %26 = tpu.matmul %24, %25, %cst_8 {dimension_numbers = #tpu.dot_dimension_numbers<[1], [0], [0], [1], [0, 0, 1, 1], [], []>} : vector<64x128xf32>, vector<128x128xf32>, vector<64x128xf32> -> vector<64x128xf32>
    %27 = vector.extract_strided_slice %1 {offsets = [2, 0], sizes = [1, 128], strides = [1, 1]} : vector<8x128xf32> to vector<1x128xf32>
    %28 = vector.broadcast %27 : vector<1x128xf32> to vector<64x128xf32>
    %29 = arith.addf %26, %28 : vector<64x128xf32>
    %cst_9 = arith.constant 0.000000e+00 : f32
    %30 = vector.broadcast %cst_9 : f32 to vector<64x128xf32>
    %31 = arith.maximumf %29, %30 : vector<64x128xf32>
    %c256 = arith.constant 256 : index
    %c0_10 = arith.constant 0 : index
    %32 = vector.load %arg2[%c256, %c0_10] : memref<384x128xf32, #tpu.memory_space<vmem>>, vector<128x128xf32>
    %cst_11 = arith.constant dense<0.000000e+00> : vector<64x128xf32>
    %33 = tpu.matmul %31, %32, %cst_11 {dimension_numbers = #tpu.dot_dimension_numbers<[1], [0], [0], [1], [0, 0, 1, 1], [], []>} : vector<64x128xf32>, vector<128x128xf32>, vector<64x128xf32> -> vector<64x128xf32>
    %34 = vector.extract_strided_slice %1 {offsets = [3, 0], sizes = [1, 128], strides = [1, 1]} : vector<8x128xf32> to vector<1x128xf32>
    %35 = vector.broadcast %34 : vector<1x128xf32> to vector<64x128xf32>
    %36 = arith.addf %33, %35 : vector<64x128xf32>
    %c0_12 = arith.constant 0 : index
    %c0_13 = arith.constant 0 : index
    %37 = vector.load %arg4[%c0_12, %c0_13] : memref<64x128xf32, #tpu.memory_space<vmem>>, vector<64x128xf32>
    tpu.vector_store %arg4[%c0_12, %c0_13], %36 {strides = array<i32>} : memref<64x128xf32, #tpu.memory_space<vmem>>, vector<64x128xf32>,
    return
  }
  func.func @transform_0(%arg0: i32) -> (i32, i32) {
    %c0_i32 = arith.constant 0 : i32
    %c0_i32_0 = arith.constant 0 : i32
    return %arg0, %c0_i32 : i32, i32
  }
  func.func @transform_1(%arg0: i32) -> (i32, i32) {
    %c0_i32 = arith.constant 0 : i32
    %c0_i32_0 = arith.constant 0 : i32
    %c0_i32_1 = arith.constant 0 : i32
    return %c0_i32, %c0_i32_0 : i32, i32
  }
  func.func @transform_2(%arg0: i32) -> (i32, i32) {
    %c0_i32 = arith.constant 0 : i32
    %c0_i32_0 = arith.constant 0 : i32
    %c0_i32_1 = arith.constant 0 : i32
    return %c0_i32, %c0_i32_0 : i32, i32
  }
  func.func @transform_3(%arg0: i32) -> (i32, i32) {
    %c0_i32 = arith.constant 0 : i32
    %c0_i32_0 = arith.constant 0 : i32
    return %arg0, %c0_i32 : i32, i32
  }
}

</mosaic_0001>

<bundles_post_ra>
// kernel: tpu_custom_call.1
= control target key start
LH: loop header
LB: loop body
LE: loop exit
PB: predicated region body
PF: predicated region fallthrough
CT: control target
= control target key end

     0   :  { %8 = vsyncpa [#allocation3], 0  ;;  %s950_s0 = inlined_call_operand.vmem [shape: f32[64,2], index: 0, kind: input, shape index: {}]   ;;  %s951_s1 = inlined_call_operand.hbm [shape: f32[384,128], index: 1, kind: input, shape index: {}]   ;;  %s952_s2 = inlined_call_operand.vmem [shape: f32[8,128], index: 2, kind: input, shape index: {}]   ;;  %s953_s3 = inlined_call_operand.hbm [shape: f32[64,128], index: 3, kind: output, shape index: {}]  }
   0x1   :  { %9 = vsyncpa [#allocation4], 0  ;;  %s869_s12 = smov [#allocation2]  }
   0x2   :  { %s17_s13 = sshll.u32 %s869_s12, 4  ;;  %s18_s13 = int_to_ptr.vmem [resolvable:$true] %s17_s13 }
   0x3   :  { %s833_s14 = scalar_lea.vmem %s18_s13, 6144  ;;  %p838_p1 = scmp.lt.s32.totalorder %s18_s13, %s18_s13 }
   0x4   :  { %p834_p0 = scmp.ne.s32.totalorder %s18_s13, %s833_s14  ;;  %p839_p2 = scmp.lt.s32.totalorder %s833_s14, %s833_s14 }
   0x6   :  { %p840_p3 = por %p839_p2, %p838_p1 }
   0x8   :  { %p841_p4 = pnand %p840_p3, %p834_p0 }
   0xa   :  { %844 = shalt.err (!%p841_p4)
}
   0xb   :  { %s870_s15 = smov 128   ;;  %s871_s16 = smov 8  }
   0xc   :  { %23 = dma.hbm_to_vmem [thread:$0]  %s951_s1, 6144, %s18_s13, [#allocation3], %s870_s15, %s870_s15, %s871_s16  }
   0xd   :  { %865 = dma.done.wait [#allocation3], 6144  }
   0xe   :  { %866 = vsyncadd [#allocation3], 4294961152  ;;  %v872_v0 = vmov 0   ;;  %v30_v1 = vld [vmem:[%s950_s0 + $0x8] sm:$0xff]  ;;  %v29_v2 = vld [vmem:[%s950_s0] sm:$0xff]  ;;  %v873_v5 = vmov 1   ;;  %v78_v38 = vlaneseq }
   0xf   :  { %822 = vset.pattern.permute.xlu1 %v872_v0  ;;  %820 = vset.pattern.permute.xlu0 %v872_v0  ;;  %v177_v3 = vld [vmem:[#allocation2 + $0x78] sm:$0xff]  ;;  %v176_v4 = vld [vmem:[#allocation2 + $0x70] sm:$0xff]  ;;  %v175_v6 = vld [vmem:[#allocation2 + $0x68] sm:$0xff] }
  0x10   :  { %45 = vperm.xlu1 %822, %v30_v1   ;;  %40 = vperm.xlu0 %820, %v29_v2   ;;  %v31_v7 = vld [vmem:[%s950_s0 + $0x10] sm:$0xff]  ;;  %v174_v8 = vld [vmem:[#allocation2 + $0x60] sm:$0xff]  ;;  %v32_v9 = vld [vmem:[%s950_s0 + $0x18] sm:$0xff]  ;;  %v925_v39 = vshrl.u32 %v78_v38, 7 }
  0x11   :  { %650 = vmatprep.subr.mxu0 %v177_v3  ;;  %v173_v10 = vld [vmem:[#allocation2 + $0x58] sm:$0xff]  ;;  %v172_v11 = vld [vmem:[#allocation2 + $0x50] sm:$0xff]  ;;  %v33_v12 = vld [vmem:[%s950_s0 + $0x20] sm:$0xff] }
  0x12   :  { %651 = vmatpush3.msra.mxu0 %v177_v3  ;;  %v171_v13 = vld [vmem:[#allocation2 + $0x48] sm:$0xff]  ;;  %v170_v14 = vld [vmem:[#allocation2 + $0x40] sm:$0xff]  ;;  %v169_v16 = vld [vmem:[#allocation2 + $0x38] sm:$0xff]  ;;  %v80_v40 = vsub.s32 4, %v925_v39  ;;  %v124_v41 = vsub.s32 5, %v925_v39  ;;  %v144_v45 = vsub.s32 0, %v925_v39 }
  0x13   :  { %652 = vmatprep.subr.mxu0 %v176_v4  ;;  %v34_v15 = vld [vmem:[%s950_s0 + $0x28] sm:$0xff]  ;;  %v168_v17 = vld [vmem:[#allocation2 + $0x30] sm:$0xff]  ;;  %v166_v20 = vld [vmem:[#allocation2 + $0x20] sm:$0xff] }
  0x14   :  { %823 = vset.pattern.permute.xlu1 %v873_v5  ;;  %821 = vset.pattern.permute.xlu0 %v873_v5  ;;  %v35_v18 = vld [vmem:[%s950_s0 + $0x30] sm:$0xff]  ;;  %v167_v19 = vld [vmem:[#allocation2 + $0x28] sm:$0xff]  ;;  %v36_v21 = vld [vmem:[%s950_s0 + $0x38] sm:$0xff] }
  0x15   :  { %95 = vperm.xlu1 %823, %v30_v1   ;;  %91 = vperm.xlu0 %821, %v29_v2   ;;  %v165_v22 = vld [vmem:[#allocation2 + $0x18] sm:$0xff]  ;;  %v164_v23 = vld [vmem:[#allocation2 + $0x10] sm:$0xff]  ;;  %v163_v24 = vld [vmem:[#allocation2 + $0x8] sm:$0xff] }
  0x16   :  { %653 = vmatpush3.msra.mxu0 %v176_v4  ;;  %v162_v25 = vld [vmem:[#allocation2] sm:$0xff]  ;;  %v310_v26 = vld [vmem:[#allocation2 + $0xf8] sm:$0xff]  ;;  %v309_v27 = vld [vmem:[#allocation2 + $0xf0] sm:$0xff] }
  0x17   :  { %654 = vmatprep.subr.mxu0 %v175_v6  ;;  %694 = vmatprep.subr.mxu1 %v310_v26  ;;  %v308_v28 = vld [vmem:[#allocation2 + $0xe8] sm:$0xff]  ;;  %v307_v29 = vld [vmem:[#allocation2 + $0xe0] sm:$0xff]  ;;  %v306_v30 = vld [vmem:[#allocation2 + $0xd8] sm:$0xff] }
  0x18   :  { %655 = vmatpush3.msra.mxu0 %v175_v6  ;;  %695 = vmatpush3.msra.mxu1 %v310_v26  ;;  %v305_v31 = vld [vmem:[#allocation2 + $0xd0] sm:$0xff]  ;;  %v304_v32 = vld [vmem:[#allocation2 + $0xc8] sm:$0xff]  ;;  %v303_v33 = vld [vmem:[#allocation2 + $0xc0] sm:$0xff] }
  0x19   :  { %824 = vset.pattern.permute.xlu1 %v872_v0  ;;  %99 = vperm.xlu0 %821, %v31_v7   ;;  %v302_v34 = vld [vmem:[#allocation2 + $0xb8] sm:$0xff]  ;;  %v301_v35 = vld [vmem:[#allocation2 + $0xb0] sm:$0xff]  ;;  %v300_v36 = vld [vmem:[#allocation2 + $0xa8] sm:$0xff] }
  0x1a   :  { %50 = vperm.xlu1 %824, %v31_v7   ;;  %656 = vmatprep.subr.mxu0 %v174_v8  ;;  %v299_v37 = vld [vmem:[#allocation2 + $0xa0] sm:$0xff] }
  0x1b   :  { %657 = vmatpush3.msra.mxu0 %v174_v8  ;;  %696 = vmatprep.subr.mxu1 %v309_v27  ;;  %v932_v42 = vld [vmem:[%s952_s2] sm:$0xff]  ;;  %s874_s2 = smov [#allocation5]  }
  0x1c   :  { %658 = vmatprep.subr.mxu0 %v173_v10  ;;  %697 = vmatpush3.msra.mxu1 %v309_v27  ;;  %v81_v46 = vrot.slane %v932_v42, %v80_v40  ;;  %v125_v47 = vrot.slane %v932_v42, %v124_v41  ;;  %v145_v50 = vrot.slane %v932_v42, %v144_v45  ;;  %v298_v40 = vld [vmem:[#allocation2 + $0x98] sm:$0xff]  ;;  %v297_v41 = vld [vmem:[#allocation2 + $0x90] sm:$0xff]  ;;  %s566_s8 = sshll.u32 %s874_s2, 4  ;;  %s567_s8 = int_to_ptr.vmem [resolvable:$true] %s566_s8 }
  0x1d   :  { %103 = vperm.xlu0 %821, %v32_v9   ;;  %659 = vmatpush3.msra.mxu0 %v173_v10  ;;  %v443_v45 = vld [vmem:[#allocation2 + $0x178] sm:$0xff]  ;;  %s845_s9 = scalar_lea.vmem %s567_s8, 1024  ;;  %p850_p6 = scmp.lt.s32.totalorder %s567_s8, %s567_s8 }
  0x1e   :  { %55 = vperm.xlu1 %824, %v32_v9   ;;  %660 = vmatprep.subr.mxu0 %v172_v11  ;;  %p846_p5 = scmp.ne.s32.totalorder %s567_s8, %s845_s9  ;;  %p851_p7 = scmp.lt.s32.totalorder %s845_s9, %s845_s9 }
  0x1f   :  { %661 = vmatpush3.msra.mxu0 %v172_v11  ;;  %698 = vmatprep.subr.mxu1 %v308_v28 }
  0x20   :  { %662 = vmatprep.subr.mxu0 %v171_v13  ;;  %699 = vmatpush3.msra.mxu1 %v308_v28  ;;  %p852_p8 = por %p851_p7, %p850_p6 }
  0x21   :  { %107 = vperm.xlu0 %821, %v33_v12   ;;  %663 = vmatpush3.msra.mxu0 %v171_v13 }
  0x22   :  { %60 = vperm.xlu1 %824, %v33_v12   ;;  %664 = vmatprep.subr.mxu0 %v170_v14  ;;  %p853_p9 = pnand %p852_p8, %p846_p5 }
  0x23   :  { %665 = vmatpush3.msra.mxu0 %v170_v14  ;;  %700 = vmatprep.subr.mxu1 %v307_v29 }
  0x24   :  { %666 = vmatprep.subr.mxu0 %v169_v16  ;;  %701 = vmatpush3.msra.mxu1 %v307_v29 }
  0x25   :  { %111 = vperm.xlu0 %821, %v34_v15   ;;  %667 = vmatpush3.msra.mxu0 %v169_v16 }
  0x26   :  { %65 = vperm.xlu1 %824, %v34_v15   ;;  %668 = vmatprep.subr.mxu0 %v168_v17 }
  0x27   :  { %669 = vmatpush3.msra.mxu0 %v168_v17  ;;  %702 = vmatprep.subr.mxu1 %v306_v30 }
  0x28   :  { %670 = vmatprep.subr.mxu0 %v167_v19  ;;  %703 = vmatpush3.msra.mxu1 %v306_v30 }
  0x29   :  { %115 = vperm.xlu0 %821, %v35_v18   ;;  %671 = vmatpush3.msra.mxu0 %v167_v19 }
  0x2a   :  { %70 = vperm.xlu1 %824, %v35_v18   ;;  %672 = vmatprep.subr.mxu0 %v166_v20 }
  0x2b   :  { %673 = vmatpush3.msra.mxu0 %v166_v20  ;;  %704 = vmatprep.subr.mxu1 %v305_v31 }
  0x2c   :  { %674 = vmatprep.subr.mxu0 %v165_v22  ;;  %705 = vmatpush3.msra.mxu1 %v305_v31 }
  0x2d   :  { %119 = vperm.xlu0 %821, %v36_v21   ;;  %675 = vmatpush3.msra.mxu0 %v165_v22 }
  0x2e   :  { %75 = vperm.xlu1 %824, %v36_v21   ;;  %676 = vmatprep.subr.mxu0 %v164_v23 }
  0x2f   :  { %677 = vmatpush3.msra.mxu0 %v164_v23  ;;  %706 = vmatprep.subr.mxu1 %v304_v32 }
  0x30   :  { %678 = vmatprep.subr.mxu0 %v163_v24  ;;  %707 = vmatpush3.msra.mxu1 %v304_v32 }
  0x31   :  { %679 = vmatpush3.msra.mxu0 %v163_v24  ;;  %708 = vmatprep.subr.mxu1 %v303_v33 }
  0x32   :  { %680 = vmatprep.subr.mxu0 %v162_v25  ;;  %709 = vmatpush3.msra.mxu1 %v303_v33 }
  0x33   :  { %681 = vmatpush3.msra.mxu0 %v162_v25  ;;  %710 = vmatprep.subr.mxu1 %v302_v34 }
  0x34   :  { %711 = vmatpush3.msra.mxu1 %v302_v34  ;;  %738 = vmatprep.subr.mxu0 %v443_v45 }
  0x35   :  { %712 = vmatprep.subr.mxu1 %v301_v35 }
  0x36   :  { %713 = vmatpush3.msra.mxu1 %v301_v35 }
  0x37   :  { %714 = vmatprep.subr.mxu1 %v300_v36 }
  0x38   :  { %715 = vmatpush3.msra.mxu1 %v300_v36 }
  0x39   :  { %716 = vmatprep.subr.mxu1 %v299_v37 }
  0x3a   :  { %717 = vmatpush3.msra.mxu1 %v299_v37 }
  0x3b   :  { %718 = vmatprep.subr.mxu1 %v298_v40 }
  0x3c   :  { %719 = vmatpush3.msra.mxu1 %v298_v40 }
  0x3d   :  { %720 = vmatprep.subr.mxu1 %v297_v41 }
  0x3e   :  { %721 = vmatpush3.msra.mxu1 %v297_v41 }
  0x8b   :  { %v46_v43 = vpop.permute.xlu1 %45  ;;  %v41_v44 = vpop.permute.xlu0 %40 }
  0x8c   :  { %v83_v51 = vmul.f32 %v81_v46, %v46_v43  ;;  %v82_v52 = vmul.f32 %v81_v46, %v41_v44  ;;  %v296_v43 = vld [vmem:[#allocation2 + $0x88] sm:$0xff]  ;;  %v295_v44 = vld [vmem:[#allocation2 + $0x80] sm:$0xff] }
  0x8d   :  { %722 = vmatprep.subr.mxu1 %v296_v43 }
  0x8e   :  { %723 = vmatpush3.msra.mxu1 %v296_v43 }
  0x8f   :  { %724 = vmatprep.subr.mxu1 %v295_v44 }
  0x90   :  { %v96_v48 = vpop.permute.xlu1 %95  ;;  %v92_v49 = vpop.permute.xlu0 %91  ;;  %725 = vmatpush3.msra.mxu1 %v295_v44 }
  0x91   :  { %v127_v53 = vmul.f32 %v125_v47, %v96_v48  ;;  %v126_v54 = vmul.f32 %v125_v47, %v92_v49  ;;  %782 = vmatprep.subr.mxu1 %v443_v45  ;;  %v440_v48 = vld [vmem:[#allocation2 + $0x160] sm:$0xff]  ;;  %v439_v49 = vld [vmem:[#allocation2 + $0x158] sm:$0xff] }
  0x93   :  { %v135_v55 = vadd.f32 %v127_v53, %v83_v51  ;;  %v134_v56 = vadd.f32 %v126_v54, %v82_v52  ;;  %v437_v51 = vld [vmem:[#allocation2 + $0x148] sm:$0xff]  ;;  %v436_v52 = vld [vmem:[#allocation2 + $0x140] sm:$0xff]  ;;  %v435_v53 = vld [vmem:[#allocation2 + $0x138] sm:$0xff] }
  0x94   :  { %v100_v57 = vpop.permute.xlu0 %99  ;;  %v434_v54 = vld [vmem:[#allocation2 + $0x130] sm:$0xff] }
  0x95   :  { %v128_v58 = vmul.f32 %v125_v47, %v100_v57  ;;  %v51_v59 = vpop.permute.xlu1 %50  ;;  %v146_v60 = vadd.f32 %v145_v50, %v134_v56  ;;  %v147_v61 = vadd.f32 %v145_v50, %v135_v55  ;;  %v433_v55 = vld [vmem:[#allocation2 + $0x128] sm:$0xff]  ;;  %v432_v56 = vld [vmem:[#allocation2 + $0x120] sm:$0xff]  ;;  %v180_v57 = vsub.s32 1, %v925_v39 }
  0x96   :  { %v84_v62 = vmul.f32 %v81_v46, %v51_v59 }
  0x97   :  { %v154_v63 = vmax.f32 %v146_v60, 0.0  ;;  %v155_v0 = vmax.f32 %v147_v61, 0.0 }
  0x98   :  { %v136_v1 = vadd.f32 %v128_v58, %v84_v62  ;;  %v104_v2 = vpop.permute.xlu0 %103  ;;  %v181_v58 = vrot.slane %v932_v42, %v180_v57 }
  0x99   :  { %v129_v3 = vmul.f32 %v125_v47, %v104_v2  ;;  %v56_v4 = vpop.permute.xlu1 %55  ;;  %682 = vmatprep.mubr.f32.mxu0 %v154_v63 }
  0x9a   :  { %v85_v5 = vmul.f32 %v81_v46, %v56_v4  ;;  %683 = vmatmul.mubr.f32.vlgmr.msra.gmra.mxu0 %v155_v0  ;;  %v148_v6 = vadd.f32 %v145_v50, %v136_v1 }
  0x9b   :  { %739 = vmatpush3.msra.mxu0 %v443_v45 }
  0x9c   :  { %v137_v7 = vadd.f32 %v129_v3, %v85_v5  ;;  %v108_v8 = vpop.permute.xlu0 %107  ;;  %v156_v9 = vmax.f32 %v148_v6, 0.0 }
  0x9d   :  { %v130_v10 = vmul.f32 %v125_v47, %v108_v8  ;;  %v61_v11 = vpop.permute.xlu1 %60 }
  0x9e   :  { %v86_v12 = vmul.f32 %v81_v46, %v61_v11  ;;  %685 = vmatprep.mubr.f32.mxu0 %v156_v9  ;;  %v149_v13 = vadd.f32 %v145_v50, %v137_v7 }
  0xa0   :  { %v138_v14 = vadd.f32 %v130_v10, %v86_v12  ;;  %v112_v15 = vpop.permute.xlu0 %111  ;;  %v157_v16 = vmax.f32 %v149_v13, 0.0 }
  0xa1   :  { %v131_v17 = vmul.f32 %v125_v47, %v112_v15  ;;  %v66_v18 = vpop.permute.xlu1 %65 }
  0xa2   :  { %v87_v19 = vmul.f32 %v81_v46, %v66_v18  ;;  %686 = vmatmul.mubr.f32.gmra.mxu0 %v157_v16  ;;  %v150_v20 = vadd.f32 %v145_v50, %v138_v14 }
  0xa4   :  { %v139_v21 = vadd.f32 %v131_v17, %v87_v19  ;;  %v116_v22 = vpop.permute.xlu0 %115  ;;  %v158_v23 = vmax.f32 %v150_v20, 0.0  ;;  %v431_v19 = vld [vmem:[#allocation2 + $0x118] sm:$0xff]  ;;  %v430_v20 = vld [vmem:[#allocation2 + $0x110] sm:$0xff] }
  0xa5   :  { %v132_v24 = vmul.f32 %v125_v47, %v116_v22  ;;  %v71_v25 = vpop.permute.xlu1 %70  ;;  %v428_v22 = vld [vmem:[#allocation2 + $0x100] sm:$0xff] }
  0xa6   :  { %v88_v26 = vmul.f32 %v81_v46, %v71_v25  ;;  %688 = vmatprep.mubr.f32.mxu0 %v158_v23  ;;  %v151_v27 = vadd.f32 %v145_v50, %v139_v21  ;;  %v429_v21 = vld [vmem:[#allocation2 + $0x108] sm:$0xff]  ;;  %v313_v23 = vsub.s32 2, %v925_v39 }
  0xa8   :  { %v140_v28 = vadd.f32 %v132_v24, %v88_v26  ;;  %v120_v29 = vpop.permute.xlu0 %119  ;;  %v159_v30 = vmax.f32 %v151_v27, 0.0  ;;  %v314_v24 = vrot.slane %v932_v42, %v313_v23 }
  0xa9   :  { %v133_v31 = vmul.f32 %v125_v47, %v120_v29  ;;  %v76_v32 = vpop.permute.xlu1 %75  ;;  %v441_v47 = vld [vmem:[#allocation2 + $0x168] sm:$0xff] }
  0xaa   :  { %v89_v33 = vmul.f32 %v81_v46, %v76_v32  ;;  %689 = vmatmul.mubr.f32.gmra.mxu0 %v159_v30  ;;  %v152_v34 = vadd.f32 %v145_v50, %v140_v28  ;;  %v442_v46 = vld [vmem:[#allocation2 + $0x170] sm:$0xff] }
  0xab   :  { %740 = vmatprep.subr.mxu0 %v442_v46 }
  0xac   :  { %v141_v35 = vadd.f32 %v133_v31, %v89_v33  ;;  %v160_v36 = vmax.f32 %v152_v34, 0.0  ;;  %741 = vmatpush3.msra.mxu0 %v442_v46 }
  0xad   :  { %742 = vmatprep.subr.mxu0 %v441_v47 }
  0xae   :  { %691 = vmatprep.mubr.f32.mxu0 %v160_v36  ;;  %v153_v37 = vadd.f32 %v145_v50, %v141_v35  ;;  %743 = vmatpush3.msra.mxu0 %v441_v47  ;;  %v438_v50 = vld [vmem:[#allocation2 + $0x150] sm:$0xff] }
  0xaf   :  { %744 = vmatprep.subr.mxu0 %v440_v48 }
  0xb0   :  { %v161_v38 = vmax.f32 %v153_v37, 0.0  ;;  %745 = vmatpush3.msra.mxu0 %v440_v48 }
  0xb1   :  { %746 = vmatprep.subr.mxu0 %v439_v49 }
  0xb2   :  { %692 = vmatmul.mubr.f32.gmra.mxu0 %v161_v38 }
  0xb3   :  { %747 = vmatpush3.msra.mxu0 %v439_v49 }
  0xb4   :  { %748 = vmatprep.subr.mxu0 %v438_v50 }
  0xb5   :  { %749 = vmatpush3.msra.mxu0 %v438_v50 }
  0xb6   :  { %750 = vmatprep.subr.mxu0 %v437_v51 }
  0xb7   :  { %751 = vmatpush3.msra.mxu0 %v437_v51 }
  0xb8   :  { %752 = vmatprep.subr.mxu0 %v436_v52 }
  0xb9   :  { %753 = vmatpush3.msra.mxu0 %v436_v52 }
  0xba   :  { %754 = vmatprep.subr.mxu0 %v435_v53 }
  0xbb   :  { %755 = vmatpush3.msra.mxu0 %v435_v53 }
  0xbc   :  { %756 = vmatprep.subr.mxu0 %v434_v54 }
  0xbd   :  { %757 = vmatpush3.msra.mxu0 %v434_v54 }
  0xbe   :  { %758 = vmatprep.subr.mxu0 %v433_v55 }
  0xbf   :  { %759 = vmatpush3.msra.mxu0 %v433_v55 }
  0xc0   :  { %760 = vmatprep.subr.mxu0 %v432_v56 }
  0xc1   :  { %761 = vmatpush3.msra.mxu0 %v432_v56 }
  0xc2   :  { %762 = vmatprep.subr.mxu0 %v431_v19 }
  0xc3   :  { %763 = vmatpush3.msra.mxu0 %v431_v19 }
  0xc4   :  { %764 = vmatprep.subr.mxu0 %v430_v20 }
  0xc5   :  { %765 = vmatpush3.msra.mxu0 %v430_v20 }
  0xc6   :  { %766 = vmatprep.subr.mxu0 %v429_v21 }
  0xc7   :  { %767 = vmatpush3.msra.mxu0 %v429_v21 }
  0xc8   :  { %768 = vmatprep.subr.mxu0 %v428_v22 }
  0xc9   :  { %769 = vmatpush3.msra.mxu0 %v428_v22 }
 0x15a   :  { %v684_v59 = vpop.f32.mrf.mxu0 }
 0x15b   :  { %v254_v60 = vadd.f32 %v684_v59, %v181_v58 }
 0x15c   :  { %v248_v61 = vpop.f32.mrf.mxu0 }
 0x15d   :  { %v249_v62 = vadd.f32 %v248_v61, %v181_v58  ;;  %v288_v0 = vmax.f32 %v254_v60, 0.0 }
 0x15f   :  { %v287_v63 = vmax.f32 %v249_v62, 0.0 }
 0x161   :  { %726 = vmatprep.mubr.f32.mxu1 %v287_v63 }
 0x162   :  { %v687_v1 = vpop.f32.mrf.mxu0  ;;  %727 = vmatmul.mubr.f32.vlgmr.msra.gmra.mxu1 %v288_v0 }
 0x163   :  { %798 = vmatpush3.msra.mxu1 %v443_v45  ;;  %v264_v2 = vadd.f32 %v687_v1, %v181_v58 }
 0x164   :  { %v258_v3 = vpop.f32.mrf.mxu0  ;;  %783 = vmatprep.subr.mxu1 %v442_v46 }
 0x165   :  { %v259_v4 = vadd.f32 %v258_v3, %v181_v58  ;;  %799 = vmatpush3.msra.mxu1 %v442_v46  ;;  %v290_v6 = vmax.f32 %v264_v2, 0.0 }
 0x166   :  { %784 = vmatprep.subr.mxu1 %v441_v47 }
 0x167   :  { %v289_v5 = vmax.f32 %v259_v4, 0.0  ;;  %800 = vmatpush3.msra.mxu1 %v441_v47 }
 0x168   :  { %785 = vmatprep.subr.mxu1 %v440_v48 }
 0x169   :  { %729 = vmatprep.mubr.f32.mxu1 %v289_v5  ;;  %801 = vmatpush3.msra.mxu1 %v440_v48 }
 0x16a   :  { %v690_v7 = vpop.f32.mrf.mxu0  ;;  %730 = vmatmul.mubr.f32.gmra.mxu1 %v290_v6  ;;  %786 = vmatprep.subr.mxu1 %v439_v49 }
 0x16b   :  { %802 = vmatpush3.msra.mxu1 %v439_v49  ;;  %v274_v8 = vadd.f32 %v690_v7, %v181_v58 }
 0x16c   :  { %v268_v9 = vpop.f32.mrf.mxu0  ;;  %787 = vmatprep.subr.mxu1 %v438_v50 }
 0x16d   :  { %v269_v10 = vadd.f32 %v268_v9, %v181_v58  ;;  %803 = vmatpush3.msra.mxu1 %v438_v50  ;;  %v292_v12 = vmax.f32 %v274_v8, 0.0 }
 0x16e   :  { %788 = vmatprep.subr.mxu1 %v437_v51 }
 0x16f   :  { %v291_v11 = vmax.f32 %v269_v10, 0.0  ;;  %804 = vmatpush3.msra.mxu1 %v437_v51  ;;  %v446_v51 = vsub.s32 3, %v925_v39 }
 0x170   :  { %789 = vmatprep.subr.mxu1 %v436_v52 }
 0x171   :  { %732 = vmatprep.mubr.f32.mxu1 %v291_v11  ;;  %805 = vmatpush3.msra.mxu1 %v436_v52  ;;  %v447_v52 = vrot.slane %v932_v42, %v446_v51 }
 0x172   :  { %v693_v13 = vpop.f32.mrf.mxu0  ;;  %733 = vmatmul.mubr.f32.gmra.mxu1 %v292_v12  ;;  %790 = vmatprep.subr.mxu1 %v435_v53 }
 0x173   :  { %806 = vmatpush3.msra.mxu1 %v435_v53  ;;  %v284_v14 = vadd.f32 %v693_v13, %v181_v58 }
 0x174   :  { %v278_v15 = vpop.f32.mrf.mxu0  ;;  %791 = vmatprep.subr.mxu1 %v434_v54 }
 0x175   :  { %v279_v16 = vadd.f32 %v278_v15, %v181_v58  ;;  %807 = vmatpush3.msra.mxu1 %v434_v54  ;;  %v294_v18 = vmax.f32 %v284_v14, 0.0 }
 0x176   :  { %792 = vmatprep.subr.mxu1 %v433_v55 }
 0x177   :  { %v293_v17 = vmax.f32 %v279_v16, 0.0  ;;  %808 = vmatpush3.msra.mxu1 %v433_v55 }
 0x178   :  { %793 = vmatprep.subr.mxu1 %v432_v56 }
 0x179   :  { %735 = vmatprep.mubr.f32.mxu1 %v293_v17  ;;  %809 = vmatpush3.msra.mxu1 %v432_v56 }
 0x17a   :  { %736 = vmatmul.mubr.f32.gmra.mxu1 %v294_v18  ;;  %794 = vmatprep.subr.mxu1 %v431_v19 }
 0x17b   :  { %810 = vmatpush3.msra.mxu1 %v431_v19 }
 0x17c   :  { %795 = vmatprep.subr.mxu1 %v430_v20 }
 0x17d   :  { %811 = vmatpush3.msra.mxu1 %v430_v20 }
 0x17e   :  { %796 = vmatprep.subr.mxu1 %v429_v21 }
 0x17f   :  { %812 = vmatpush3.msra.mxu1 %v429_v21 }
 0x180   :  { %797 = vmatprep.subr.mxu1 %v428_v22 }
 0x181   :  { %813 = vmatpush3.msra.mxu1 %v428_v22 }
 0x222   :  { %v728_v25 = vpop.f32.mrf.mxu1 }
 0x223   :  { %v387_v26 = vadd.f32 %v728_v25, %v314_v24 }
 0x224   :  { %v381_v27 = vpop.f32.mrf.mxu1 }
 0x225   :  { %v382_v28 = vadd.f32 %v381_v27, %v314_v24  ;;  %v421_v30 = vmax.f32 %v387_v26, 0.0 }
 0x227   :  { %v420_v29 = vmax.f32 %v382_v28, 0.0 }
 0x229   :  { %770 = vmatprep.mubr.f32.mxu0 %v420_v29 }
 0x22a   :  { %v731_v31 = vpop.f32.mrf.mxu1  ;;  %771 = vmatmul.mubr.f32.vlgmr.msra.gmra.mxu0 %v421_v30 }
 0x22b   :  { %v397_v32 = vadd.f32 %v731_v31, %v314_v24 }
 0x22c   :  { %v391_v33 = vpop.f32.mrf.mxu1 }
 0x22d   :  { %v392_v34 = vadd.f32 %v391_v33, %v314_v24  ;;  %v423_v36 = vmax.f32 %v397_v32, 0.0 }
 0x22f   :  { %v422_v35 = vmax.f32 %v392_v34, 0.0 }
 0x231   :  { %773 = vmatprep.mubr.f32.mxu0 %v422_v35 }
 0x232   :  { %v734_v37 = vpop.f32.mrf.mxu1  ;;  %774 = vmatmul.mubr.f32.gmra.mxu0 %v423_v36 }
 0x233   :  { %v407_v38 = vadd.f32 %v734_v37, %v314_v24 }
 0x234   :  { %v401_v40 = vpop.f32.mrf.mxu1 }
 0x235   :  { %v402_v41 = vadd.f32 %v401_v40, %v314_v24  ;;  %v425_v44 = vmax.f32 %v407_v38, 0.0 }
 0x237   :  { %v424_v43 = vmax.f32 %v402_v41, 0.0 }
 0x239   :  { %776 = vmatprep.mubr.f32.mxu1 %v424_v43 }
 0x23a   :  { %v737_v45 = vpop.f32.mrf.mxu1  ;;  %777 = vmatmul.mubr.f32.vlgmr.msra.gmra.mxu1 %v425_v44 }
 0x23b   :  { %v417_v46 = vadd.f32 %v737_v45, %v314_v24 }
 0x23c   :  { %v411_v47 = vpop.f32.mrf.mxu1 }
 0x23d   :  { %v412_v48 = vadd.f32 %v411_v47, %v314_v24  ;;  %v427_v50 = vmax.f32 %v417_v46, 0.0 }
 0x23f   :  { %v426_v49 = vmax.f32 %v412_v48, 0.0 }
 0x241   :  { %779 = vmatprep.mubr.f32.mxu1 %v426_v49 }
 0x242   :  { %780 = vmatmul.mubr.f32.gmra.mxu1 %v427_v50 }
 0x2ea   :  { %v772_v53 = vpop.f32.mrf.mxu0 }
 0x2eb   :  { %v520_v54 = vadd.f32 %v772_v53, %v447_v52 }
 0x2ec   :  { %v514_v55 = vpop.f32.mrf.mxu0 }
 0x2ed   :  { %554 = vst [vmem:[#allocation5 + $0x8] sm:$0xff] %v520_v54  ;;  %v515_v56 = vadd.f32 %v514_v55, %v447_v52 }
 0x2ef   :  { %553 = vst [vmem:[#allocation5] sm:$0xff] %v515_v56 }
 0x2f2   :  { %v775_v57 = vpop.f32.mrf.mxu0 }
 0x2f3   :  { %v530_v58 = vadd.f32 %v775_v57, %v447_v52 }
 0x2f4   :  { %v524_v59 = vpop.f32.mrf.mxu0 }
 0x2f5   :  { %556 = vst [vmem:[#allocation5 + $0x18] sm:$0xff] %v530_v58  ;;  %v525_v60 = vadd.f32 %v524_v59, %v447_v52 }
 0x2f7   :  { %555 = vst [vmem:[#allocation5 + $0x10] sm:$0xff] %v525_v60 }
 0x2fa   :  { %v778_v61 = vpop.f32.mrf.mxu1 }
 0x2fb   :  { %v540_v62 = vadd.f32 %v778_v61, %v447_v52 }
 0x2fc   :  { %v534_v63 = vpop.f32.mrf.mxu1 }
 0x2fd   :  { %558 = vst [vmem:[#allocation5 + $0x28] sm:$0xff] %v540_v62  ;;  %v535_v0 = vadd.f32 %v534_v63, %v447_v52 }
 0x2ff   :  { %557 = vst [vmem:[#allocation5 + $0x20] sm:$0xff] %v535_v0 }
 0x302   :  { %v781_v39 = vpop.f32.mrf.mxu1 }
 0x303   :  { %v550_v42 = vadd.f32 %v781_v39, %v447_v52 }
 0x304   :  { %v544_v1 = vpop.f32.mrf.mxu1 }
 0x305   :  { %560 = vst [vmem:[#allocation5 + $0x38] sm:$0xff] %v550_v42  ;;  %v545_v2 = vadd.f32 %v544_v1, %v447_v52 }
 0x307   :  { %559 = vst [vmem:[#allocation5 + $0x30] sm:$0xff] %v545_v2 }
 0x308   :  { %856 = shalt.err (!%p853_p9)
}
 0x309   :  { %572 = dma.vmem_to_hbm [thread:$0]  %s567_s8, 1024, %s953_s3, [#allocation4], %s870_s15, %s870_s15, %s871_s16  }
 0x30a   :  { %867 = dma.done.wait [#allocation4], 1024  }
 0x30b   :  { %868 = vsyncadd [#allocation4], 4294966272 }
 0x30c   :  { %576 = vsyncpa [#allocation3], 1 }
 0x30d   :  { %577 = vsyncpa [#allocation4], 1 }

</bundles_post_ra>
